<compile_context>
chip_gen: v7x
topology: tpu7x:2x2x1
jax: 0.10.0
libtpu: 0.0.40
codegen_flags: <defaults>
</compile_context>

<pallas_src>
import math

import jax
import jax.numpy as jnp
from jax.experimental import pallas as pl
from jax.experimental.pallas import tpu as pltpu


def _pphead_kernel(z_ref, s_ref, w_ref, b_ref, o_ref):
    # z_ref : (BN, C, HW)  raw NCHW activations with H,W flattened (free view)
    # s_ref : (HW, P)      part selector with 1/count folded in (pooling matrix)
    # w_ref : (h, C)       fc weight in its native PyTorch layout
    # b_ref : (h, 1)       fc bias as a column (broadcasts over the P lanes)
    # o_ref : (BN, h, P)   transposed output block (wrapper swaps the tiny axes)
    BN, C, HW = z_ref.shape

    if BN == 1:
        zp = z_ref[0]                                  # (C, HW) — simple squeeze
    else:
        # Free view: BN > 1 is only selected by the wrapper when C % 8 == 0,
        # so merging (BN, C) keeps the sublane tiling intact (no relayout).
        zp = z_ref[...].reshape(BN * C, HW)

    # One MXU matmul performs the masked per-part mean for every (image,
    # channel) row at once: (BN*C, HW) @ (HW, P) -> (BN*C, P).
    pooled = jnp.dot(zp, s_ref[...], preferred_element_type=jnp.float32)

    w = w_ref[...]                                     # (h, C)
    bias = b_ref[...]                                  # (h, 1)
    for b in range(BN):                                # BN is small & static
        pb = pooled[b * C:(b + 1) * C, :]              # (C, P), sublane-aligned
        out_t = jnp.dot(w, pb, preferred_element_type=jnp.float32)   # (h, P)
        o_ref[b] = (out_t + bias).astype(o_ref.dtype)


def _choose_bn(n, c, bytes_per_image, max_block_bytes=6 * 1024 * 1024):
    """Largest batch block that divides n, fits the VMEM budget, keeps grid >= 2."""
    bn = 1
    for cand in range(1, n + 1):
        if n % cand:
            continue
        if cand > 1 and c % 8 != 0:
            continue                        # keep the in-kernel reshape free
        if cand * bytes_per_image > max_block_bytes:
            continue                        # double-buffered block must fit VMEM
        if n >= 2 and n // cand < 2:
            continue                        # >= 2 grid steps (megacore/pipelining)
        bn = cand
    return bn


def pphead_forward(z_nchw, w_fc, b_fc, h):
    """PPHead forward. z_nchw: [N, C, H, W]; w_fc: [h, C]; b_fc: [h] -> [N, P, h]."""
    N, C, H, W = z_nchw.shape
    s = math.ceil(H / h)
    P = math.ceil(H / s)
    HW = H * W

    # Free view of the contiguous NCHW tensor — no transpose / pad pre-pass.
    z_flat = z_nchw.reshape(N, C, HW)

    # Selector: sel[hw, p] = 1/count_p if the H-row of `hw` lies in part p.
    part_of_hw = (jnp.arange(HW, dtype=jnp.int32) // W) // s
    onehot = part_of_hw[:, None] == jnp.arange(P, dtype=jnp.int32)[None, :]
    counts = jnp.asarray(
        [(min((p + 1) * s, H) - p * s) * W for p in range(P)], jnp.float32)
    sel = (onehot.astype(jnp.float32) / counts[None, :]).astype(z_flat.dtype)

    w_hc = w_fc.astype(jnp.float32)                     # (h, C)
    b_col = b_fc.astype(jnp.float32).reshape(h, 1)      # (h, 1)

    itemsize = jnp.dtype(z_flat.dtype).itemsize
    BN = _choose_bn(N, C, C * HW * itemsize)
    grid = (N // BN,)

    cost = pl.CostEstimate(
        flops=int(2 * N * C * HW * P + 2 * N * h * C * P),
        transcendentals=0,
        bytes_accessed=int(N * C * HW * itemsize + HW * P * itemsize
                           + h * C * 4 + N * P * h * 4),
    )

    out_t = pl.pallas_call(
        _pphead_kernel,
        out_shape=jax.ShapeDtypeStruct((N, h, P), jnp.float32),
        grid_spec=pltpu.PrefetchScalarGridSpec(
            num_scalar_prefetch=0,
            grid=grid,
            in_specs=[
                pl.BlockSpec((BN, C, HW), lambda n: (n, 0, 0)),
                pl.BlockSpec((HW, P), lambda n: (0, 0)),
                pl.BlockSpec((h, C), lambda n: (0, 0)),
                pl.BlockSpec((h, 1), lambda n: (0, 0)),
            ],
            out_specs=pl.BlockSpec((BN, h, P), lambda n: (n, 0, 0)),
        ),
        compiler_params=pltpu.CompilerParams(
            dimension_semantics=("parallel",)),
        cost_estimate=cost,
    )(z_flat, sel, w_hc, b_col)

    # Tiny (N*P*h element) axis swap so every in-kernel matmul stays in the
    # standard MXU orientation (no in-kernel transposes of odd-shaped tiles).
    return jnp.transpose(out_t, (0, 2, 1))


def pphead_reference(z_nchw, w_fc, b_fc, h):
    """Pure-JAX reference mirroring the PyTorch module."""
    N, C, H, W = z_nchw.shape
    s = math.ceil(H / h)
    P = math.ceil(H / s)
    parts = [z_nchw[:, :, p * s:min((p + 1) * s, H), :] for p in range(P)]
    pooled = jnp.stack([pt.mean(axis=(2, 3)) for pt in parts], axis=1)  # (N,P,C)
    return jnp.einsum("npc,kc->npk", pooled, w_fc,
                      precision=jax.lax.Precision.HIGHEST) + b_fc


if __name__ == "__main__":
    # Small shapes consistent with the module; H=18 exercises the ragged last part.
    N, C, H, W = 2, 32, 18, 16     # feat_dim = C = 32
    h = 4

    key = jax.random.PRNGKey(0)
    kz, kw, kb = jax.random.split(key, 3)

    z = jax.random.normal(kz, (N, C, H, W), dtype=jnp.float32)

    # deterministic Linear(feat_dim, h) init (PyTorch-style uniform bound)
    bound = 1.0 / math.sqrt(C)
    w_fc = jax.random.uniform(kw, (h, C), jnp.float32, -bound, bound)
    b_fc = jax.random.uniform(kb, (h,), jnp.float32, -bound, bound)

    out = pphead_forward(z, w_fc, b_fc, h)
    out = jax.block_until_ready(out)

    ref = pphead_reference(z, w_fc, b_fc, h)
    assert out.shape == ref.shape, (out.shape, ref.shape)
    # Tolerance covers MXU f32 pass-decomposition differences vs the XLA reference.
    assert jnp.allclose(out, ref, atol=2e-3, rtol=2e-3), "mismatch vs reference"

    print("KERNEL_OK")
</pallas_src>

<mosaic_0001>
module attributes {stable_mosaic.version = 11 : i64} {
  func.func @_pphead_kernel(%arg0: i32, %arg1: memref<1x32x288xf32, #tpu.memory_space<vmem>>, %arg2: memref<288x4xf32, #tpu.memory_space<vmem>>, %arg3: memref<4x32xf32, #tpu.memory_space<vmem>>, %arg4: memref<4x1xf32, #tpu.memory_space<vmem>>, %arg5: memref<1x4x4xf32, #tpu.memory_space<vmem>>) attributes {dimension_semantics = [#tpu.dimension_semantics<parallel>], iteration_bounds = array<i64: 2>, scalar_prefetch = 0 : i64, scratch_operands = 0 : i64, tpu.core_type = #tpu.core_type<tc>, window_params = [{transform_indices = @transform_0, window_bounds = array<i64: 1, 32, 288>}, {pipeline_mode = #tpu.pipeline_mode<synchronous>, transform_indices = @transform_1, window_bounds = array<i64: 288, 4>}, {pipeline_mode = #tpu.pipeline_mode<synchronous>, transform_indices = @transform_2, window_bounds = array<i64: 4, 32>}, {pipeline_mode = #tpu.pipeline_mode<synchronous>, transform_indices = @transform_3, window_bounds = array<i64: 4, 1>}, {transform_indices = @transform_4, window_bounds = array<i64: 1, 4, 4>}]} {
    %c0 = arith.constant 0 : index
    %c0_0 = arith.constant 0 : index
    %c0_1 = arith.constant 0 : index
    %0 = vector.load %arg1[%c0, %c0_0, %c0_1] : memref<1x32x288xf32, #tpu.memory_space<vmem>>, vector<1x32x288xf32>
    %1 = vector.shape_cast %0 : vector<1x32x288xf32> to vector<32x288xf32>
    %c0_2 = arith.constant 0 : index
    %c0_3 = arith.constant 0 : index
    %2 = vector.load %arg2[%c0_2, %c0_3] : memref<288x4xf32, #tpu.memory_space<vmem>>, vector<288x4xf32>
    %cst = arith.constant dense<0.000000e+00> : vector<32x4xf32>
    %3 = tpu.matmul %1, %2, %cst {dimension_numbers = #tpu.dot_dimension_numbers<[1], [0], [0], [1], [0, 0, 1, 1], [], []>} : vector<32x288xf32>, vector<288x4xf32>, vector<32x4xf32> -> vector<32x4xf32>
    %c0_4 = arith.constant 0 : index
    %c0_5 = arith.constant 0 : index
    %4 = vector.load %arg3[%c0_4, %c0_5] : memref<4x32xf32, #tpu.memory_space<vmem>>, vector<4x32xf32>
    %c0_6 = arith.constant 0 : index
    %c0_7 = arith.constant 0 : index
    %5 = vector.load %arg4[%c0_6, %c0_7] : memref<4x1xf32, #tpu.memory_space<vmem>>, vector<4x1xf32>
    %cst_8 = arith.constant dense<0.000000e+00> : vector<4x4xf32>
    %6 = tpu.matmul %4, %3, %cst_8 {dimension_numbers = #tpu.dot_dimension_numbers<[1], [0], [0], [1], [0, 0, 1, 1], [], []>} : vector<4x32xf32>, vector<32x4xf32>, vector<4x4xf32> -> vector<4x4xf32>
    %7 = vector.broadcast %5 : vector<4x1xf32> to vector<4x4xf32>
    %8 = arith.addf %6, %7 : vector<4x4xf32>
    %c0_9 = arith.constant 0 : index
    %c0_10 = arith.constant 0 : index
    %c0_11 = arith.constant 0 : index
    %9 = vector.load %arg5[%c0_9, %c0_10, %c0_11] : memref<1x4x4xf32, #tpu.memory_space<vmem>>, vector<1x4x4xf32>
    %10 = vector.shape_cast %9 : vector<1x4x4xf32> to vector<4x4xf32>
    %11 = vector.shape_cast %8 : vector<4x4xf32> to vector<1x4x4xf32>
    tpu.vector_store %arg5[%c0_9, %c0_10, %c0_11], %11 {strides = array<i32>} : memref<1x4x4xf32, #tpu.memory_space<vmem>>, vector<1x4x4xf32>,
    return
  }
  func.func @transform_0(%arg0: i32) -> (i32, i32, i32) {
    %c0_i32 = arith.constant 0 : i32
    %c0_i32_0 = arith.constant 0 : i32
    %c0_i32_1 = arith.constant 0 : i32
    return %arg0, %c0_i32, %c0_i32_0 : i32, i32, i32
  }
  func.func @transform_1(%arg0: i32) -> (i32, i32) {
    %c0_i32 = arith.constant 0 : i32
    %c0_i32_0 = arith.constant 0 : i32
    %c0_i32_1 = arith.constant 0 : i32
    return %c0_i32, %c0_i32_0 : i32, i32
  }
  func.func @transform_2(%arg0: i32) -> (i32, i32) {
    %c0_i32 = arith.constant 0 : i32
    %c0_i32_0 = arith.constant 0 : i32
    %c0_i32_1 = arith.constant 0 : i32
    return %c0_i32, %c0_i32_0 : i32, i32
  }
  func.func @transform_3(%arg0: i32) -> (i32, i32) {
    %c0_i32 = arith.constant 0 : i32
    %c0_i32_0 = arith.constant 0 : i32
    %c0_i32_1 = arith.constant 0 : i32
    return %c0_i32, %c0_i32_0 : i32, i32
  }
  func.func @transform_4(%arg0: i32) -> (i32, i32, i32) {
    %c0_i32 = arith.constant 0 : i32
    %c0_i32_0 = arith.constant 0 : i32
    %c0_i32_1 = arith.constant 0 : i32
    return %arg0, %c0_i32, %c0_i32_0 : i32, i32, i32
  }
}

</mosaic_0001>

<bundles_post_ra>
// kernel: tpu_custom_call.1
= control target key start
LH: loop header
LB: loop body
LE: loop exit
PB: predicated region body
PF: predicated region fallthrough
CT: control target
= control target key end

     0   :  { %9 = vsyncpa [#allocation3], 0  ;;  %s1097_s0 = inlined_call_operand.vmem [shape: f32[2,32,288], index: 0, kind: input, shape index: {}]   ;;  %s1098_s1 = inlined_call_operand.vmem [shape: f32[288,4], index: 1, kind: input, shape index: {}]   ;;  %s1099_s2 = inlined_call_operand.vmem [shape: f32[4,32], index: 2, kind: input, shape index: {}]   ;;  %s1100_s3 = inlined_call_operand.vmem [shape: f32[4,1], index: 3, kind: input, shape index: {}]   ;;  %s1101_s4 = inlined_call_operand.hbm [shape: f32[2,4,4], index: 4, kind: output, shape index: {}]  }
   0x1   :  { %11 = vsyncpa [#allocation3 + $0x1], 0  ;;  %s864_s15 = smov 0   ;;  %s866_s16 = smov 0  }
   0x2   :  { %s868_s17 = smov 0   ;;  %s870_s18 = smov 0  }
   0x3 LB: > { %s885_s19 = sadd.s32 4294967295, %s832_s18   ;;  %s582_s20 = sadd.s32 4294967294, %s832_s18   ;;  %s832_s18 = sphi %s870_s18, %s1107_s18   ;;  %s828_s17 = sphi %s868_s17, %s1106_s17   ;;  %s824_s16 = sphi %s866_s16, %s1105_s16   ;;  %s820_s15 = sphi %s864_s15, %s1104_s15  }
   0x4   : > { %s889_s21 = sadd.s32 1, %s832_s18   ;;  %s113_s22 = sadd.s32 1, %s828_s17 }
   0x5   : > { %s110_s23 = ssub.s32 %s832_s18, %s889_s21  ;;  %p123_p0 = scmp.ne.s32.totalorder %s828_s17, %s824_s16 }
   0x6   : > { %p111_p1 = scmp.eq.s32.totalorder %s110_s23, 0  ;;  %p124_p2 = scmp.eq.s32.totalorder %s885_s19, 1 }
   0x7   : > { %p129_p3 = scmp.ne.s32.totalorder %s824_s16, %s820_s15  ;;  %p130_p4 = scmp.eq.s32.totalorder %s582_s20, 1 }
   0x8   : > { %s900_s24 = scalar_select %p111_p1, %s828_s17, %s113_s22  }
   0x9   : > { %p902_p5 = por %p124_p2, %p123_p0  ;;  %p906_p6 = por %p130_p4, %p129_p3 }
   0xa   : > { %p585_p7 = scmp.ge.s32.totalorder %s832_s18, 1  ;;  %p165_p8 = scmp.lt.s32.totalorder %s832_s18, 3 }
   0xc   : > { %p166_p9 = pnand %p585_p7, %p165_p8 }
   0xd   : > { %v224_v0 = vld [vmem:[%s1098_s1 + $0x80] sm:$0xff] (!%p166_p9)  ;;  %v225_v1 = vld [vmem:[%s1098_s1 + $0x88] sm:$0xff] (!%p166_p9)  ;;  %p191_p10 = scmp.lt.s32.totalorder (!%p166_p9), %s885_s19, 1  ;;  %v226_v5 = vld [vmem:[%s1098_s1 + $0x90] sm:$0xff] (!%p166_p9)  ;;  %vm244_vm0 = vcmask (!%p166_p9), 261120   ;;  %vm835_vm1 = vmmov (!%p166_p9), 0  }
   0xe   : > { %169 = sbr.rel (%p166_p9) target bundleno = 510 (0x1fe), region = 36  ;;  %v208_v2 = vld [vmem:[%s1098_s1] sm:$0xff] (!%p166_p9)  ;;  %v679_v3 = vpack.c.bf16 (!%p166_p9), %v225_v1, %v224_v0  ;;  %v209_v4 = vld [vmem:[%s1098_s1 + $0x8] sm:$0xff] (!%p166_p9)  ;;  %v227_v6 = vld [vmem:[%s1098_s1 + $0x98] sm:$0xff] (!%p166_p9)  ;;  %s188_s22 = sand.u32 (!%p166_p9), 1, %s824_s16   ;;  %vm507_vm2 = vcmask (!%p166_p9), 27648  }
   0xf   : > { %v681_v7 = vpack.c.bf16 (!%p166_p9), %v209_v4, %v208_v2  ;;  %v683_v8 = vpack.c.bf16 (!%p166_p9), %v227_v6, %v226_v5  ;;  %v210_v9 = vld [vmem:[%s1098_s1 + $0x10] sm:$0xff] (!%p166_p9)  ;;  %v211_v10 = vld [vmem:[%s1098_s1 + $0x18] sm:$0xff] (!%p166_p9)  ;;  %v228_v11 = vld [vmem:[%s1098_s1 + $0xa0] sm:$0xff] (!%p166_p9)  ;;  %v834_v2 = vmov (!%p166_p9), 0.0|0.0   ;;  %v837_v5 = vmov (!%p166_p9), 0   ;;  %s594_s23 = sshll.u32 (!%p166_p9), %s885_s19, 6 }
  0x10   : > { %680 = vmatprep.subr.bf16.mxu0 (!%p166_p9), %v679_v3  ;;  %v229_v12 = vld [vmem:[%s1098_s1 + $0xa8] sm:$0xff] (!%p166_p9)  ;;  %v685_v13 = vpack.c.bf16 (!%p166_p9), %v211_v10, %v210_v9  ;;  %v212_v15 = vld [vmem:[%s1098_s1 + $0x20] sm:$0xff] (!%p166_p9)  ;;  %v230_v17 = vld [vmem:[%s1098_s1 + $0xb0] sm:$0xff] (!%p166_p9)  ;;  %v836_v3 = vmov (!%p166_p9), 0.0   ;;  %769 = vset.pattern.permute.xlu0 (!%p166_p9), %v837_v5  ;;  %s1055_s5 = scalar_lea.hbm (!%p166_p9), %s1101_s4, %s594_s23  ;;  %s510_s6 = scalar_lea.sflag (!%p166_p9), [#allocation3], %s188_s22 }
  0x11   : > { %682 = vmatpush3.bf16.msra.mxu0 (!%p166_p9), %v681_v7  ;;  %v687_v14 = vpack.c.bf16 (!%p166_p9), %v229_v12, %v228_v11  ;;  %v213_v16 = vld [vmem:[%s1098_s1 + $0x28] sm:$0xff] (!%p166_p9)  ;;  %v231_v18 = vld [vmem:[%s1098_s1 + $0xb8] sm:$0xff] (!%p166_p9)  ;;  %v214_v20 = vld [vmem:[%s1098_s1 + $0x30] sm:$0xff] (!%p166_p9) }
  0x12   : > { %684 = vmatprep.subr.bf16.mxu0 (!%p166_p9), %v683_v8  ;;  %v689_v19 = vpack.c.bf16 (!%p166_p9), %v213_v16, %v212_v15  ;;  %v691_v21 = vpack.c.bf16 (!%p166_p9), %v231_v18, %v230_v17  ;;  %v215_v22 = vld [vmem:[%s1098_s1 + $0x38] sm:$0xff] (!%p166_p9)  ;;  %v240_v23 = vld [vmem:[%s1098_s1 + $0x100] sm:$0xff] (!%p166_p9)  ;;  %v241_v24 = vld [vmem:[%s1098_s1 + $0x108] sm:$0xff] (!%p166_p9) }
  0x13   : > { %v232_v25 = vld [vmem:[%s1098_s1 + $0xc0] sm:$0xff] (!%p166_p9)  ;;  %v233_v26 = vld [vmem:[%s1098_s1 + $0xc8] sm:$0xff] (!%p166_p9)  ;;  %v711_v27 = vpack.c.bf16 (!%p166_p9), %v241_v24, %v240_v23  ;;  %v242_v28 = vld [vmem:[%s1098_s1 + $0x110] sm:$0xff] (!%p166_p9)  ;;  %v693_v30 = vpack.c.bf16 (!%p166_p9), %v215_v22, %v214_v20 }
  0x14   : > { %v243_v29 = vld [vmem:[%s1098_s1 + $0x118] sm:$0xff] (!%p166_p9)  ;;  %v695_v34 = vpack.c.bf16 (!%p166_p9), %v233_v26, %v232_v25  ;;  %v216_v35 = vld [vmem:[%s1098_s1 + $0x40] sm:$0xff] (!%p166_p9)  ;;  %v217_v36 = vld [vmem:[%s1098_s1 + $0x48] sm:$0xff] (!%p166_p9) }
  0x15   : > { %s192_s28 = scalar_select %p191_p10, %s885_s19, 1  ;;  %686 = vmatpush3.bf16.msra.mxu0 %v685_v13  ;;  %712 = vmatprep.subr.bf16.mxu1 %v711_v27  ;;  %v715_v31 = vpack.c.bf16 %v243_v29, %v242_v28  ;;  %v234_v37 = vld [vmem:[%s1098_s1 + $0xd0] sm:$0xff]  ;;  %v235_v38 = vld [vmem:[%s1098_s1 + $0xd8] sm:$0xff]  ;;  %v697_v39 = vpack.c.bf16 %v217_v36, %v216_v35  ;;  %v236_v44 = vld [vmem:[%s1098_s1 + $0xe0] sm:$0xff] }
  0x16   : > { %688 = vmatprep.subr.bf16.mxu0 %v687_v14  ;;  %714 = vmatpush3.bf16.msra.mxu1 %v711_v27  ;;  %v699_v40 = vpack.c.bf16 %v235_v38, %v234_v37  ;;  %v218_v41 = vld [vmem:[%s1098_s1 + $0x50] sm:$0xff]  ;;  %v219_v42 = vld [vmem:[%s1098_s1 + $0x58] sm:$0xff]  ;;  %v237_v45 = vld [vmem:[%s1098_s1 + $0xe8] sm:$0xff]  ;;  %s838_s19 = smov [#allocation2]  }
  0x17   : > { %s725_s9 = smul.u32 96, %s192_s28  ;;  %716 = vmatprep.subr.bf16.mxu1 %v715_v31  ;;  %v701_v47 = vpack.c.bf16 %v219_v42, %v218_v41  ;;  %v703_v48 = vpack.c.bf16 %v237_v45, %v236_v44  ;;  %v220_v49 = vld [vmem:[%s1098_s1 + $0x60] sm:$0xff]  ;;  %v221_v50 = vld [vmem:[%s1098_s1 + $0x68] sm:$0xff]  ;;  %v238_v52 = vld [vmem:[%s1098_s1 + $0xf0] sm:$0xff]  ;;  %s774_s10 = sshll.u32 %s838_s19, 4  ;;  %s775_s10 = int_to_ptr.vmem [resolvable:$false] %s774_s10 }
  0x18   : > { %v239_v53 = vld [vmem:[%s1098_s1 + $0xf8] sm:$0xff]  ;;  %v705_v54 = vpack.c.bf16 %v221_v50, %v220_v49  ;;  %v222_v56 = vld [vmem:[%s1098_s1 + $0x70] sm:$0xff]  ;;  %v428_v4 = vld [vmem:[%s1100_s3] sm:$0xf]  ;;  %s776_s11 = scalar_lea.vmem %s775_s10, 128 }
  0x19   : > { %s971_s7 = scalar_lea.vmem %s1097_s0, %s725_s9  ;;  %690 = vmatpush3.bf16.msra.mxu0 %v689_v19  ;;  %v707_v55 = vpack.c.bf16 %v239_v53, %v238_v52  ;;  %v223_v57 = vld [vmem:[%s1098_s1 + $0x78] sm:$0xff]  ;;  %431 = vperm.xlu0 %769, %v428_v4   ;;  %v427_v28 = vld [vmem:[%s1099_s2] sm:$0xf]  ;;  %s586_s9 = sshll.u32 %s188_s22, 2 }
  0x1a   : > { %v197_v32 = vld [vmem:[%s971_s7 + $0x8] sm:$0xff]  ;;  %v198_v33 = vld [vmem:[%s971_s7 + $0x10] sm:$0xff]  ;;  %692 = vmatprep.subr.bf16.mxu0 %v691_v21  ;;  %718 = vmatpush3.bf16.msra.mxu1 %v715_v31  ;;  %v204_v46 = vld [vmem:[%s971_s7 + $0x40] sm:$0xff]  ;;  %v709_v58 = vpack.c.bf16 %v223_v57, %v222_v56  ;;  %s190_s27 = scalar_lea.vmem [#allocation2], %s586_s9 }
  0x1b   : > { %321 = vmatprep.mubr.f32.mxu0 %v197_v32  ;;  %662 = vmatprep.mubr.msk.f32.mxu1 %vm244_vm0, %v198_v33  ;;  %v201_v43 = vld [vmem:[%s971_s7 + $0x28] sm:$0xff]  ;;  %v207_v51 = vld [vmem:[%s971_s7 + $0x58] sm:$0xff]  ;;  %v196_v59 = vld [vmem:[%s971_s7] sm:$0xff]  ;;  %s523_s28 = sshll.u32 %s190_s27, 4  ;;  %s1057_s28 = int_to_ptr.vmem [resolvable:$true] %s523_s28 }
  0x1c   : > { %v200_v60 = vld [vmem:[%s971_s7 + $0x20] sm:$0xff]  ;;  %v199_v61 = vld [vmem:[%s971_s7 + $0x18] sm:$0xff]  ;;  %v202_v63 = vld [vmem:[%s971_s7 + $0x30] sm:$0xff]  ;;  %719 = vmatprep.subr.bf16.mxu1 %v834_v2  ;;  %s770_s8 = scalar_lea.vmem %s1057_s28, 64  ;;  %p777_p0 = scmp.lt.s32.totalorder %s1057_s28, %s775_s10 }
  0x1d   : > { %694 = vmatpush3.bf16.msra.mxu0 %v693_v30  ;;  %663 = vmatmul.mubr.msk.f32.vlgmr.msra.gmra.mrb[0].mxu1 %vm244_vm0, %v201_v43  ;;  %v203_v62 = vld [vmem:[%s971_s7 + $0x38] sm:$0xff]  ;;  %v206_v0 = vld [vmem:[%s971_s7 + $0x50] sm:$0xff]  ;;  %v205_v1 = vld [vmem:[%s971_s7 + $0x48] sm:$0xff]  ;;  %p771_p11 = scmp.ne.s32.totalorder %s1057_s28, %s770_s8  ;;  %p778_p1 = scmp.lt.s32.totalorder %s776_s11, %s770_s8 }
  0x1e   : > { %696 = vmatprep.subr.bf16.mxu0 %v695_v34  ;;  %665 = vmatprep.mubr.msk.f32.mxu1 %vm244_vm0, %v204_v46 }
  0x1f   : > { %p772_p12 = pnand %p771_p11, %p902_p5  ;;  %p779_p2 = por %p778_p1, %p777_p0 }
  0x21   : > { %698 = vmatpush3.bf16.msra.mxu0 %v697_v39  ;;  %666 = vmatmul.mubr.msk.f32.gmra.mrb[2].mxu1 %vm244_vm0, %v207_v51  ;;  %p773_p13 = pneg %p772_p12 }
  0x22   : > { %700 = vmatprep.subr.bf16.mxu0 %v699_v40  ;;  %676 = vmatprep.mubr.msk.f32.mxu1 %vm835_vm1, %v836_v3 }
  0x23   : > { %p780_p3 = pnand %p779_p2, %p773_p13 }
  0x25   : > { %702 = vmatpush3.bf16.msra.mxu0 %v701_v47 }
  0x26   : > { %704 = vmatprep.subr.bf16.mxu0 %v703_v48 }
  0x29   : > { %706 = vmatpush3.bf16.msra.mxu0 %v705_v54 }
  0x2a   : > { %708 = vmatprep.subr.bf16.mxu0 %v707_v55 }
  0x2d   : > { %710 = vmatpush3.bf16.msra.mxu0 %v709_v58 }
  0x30   : > { %322 = vmatmul.mubr.f32.vlgmr.msra.gmra.mrb[0].mxu0 %v196_v59 }
  0x31   : > { %326 = vmatprep.mubr.f32.mxu0 %v200_v60 }
  0x34   : > { %327 = vmatmul.mubr.f32.gmra.mrb[2].mxu0 %v199_v61 }
  0x35   : > { %331 = vmatprep.mubr.f32.mxu0 %v203_v62 }
  0x38   : > { %332 = vmatmul.mubr.f32.gmra.mrb[4].mxu0 %v202_v63 }
  0x39   : > { %336 = vmatprep.mubr.f32.mxu0 %v206_v0 }
  0x3c   : > { %337 = vmatmul.mubr.f32.gmra.mrb[6].mxu0 %v205_v1 }
  0x98   : > { %v432_v29 = vpop.permute.xlu0 %431 }
  0xf0   : > { %v664_v6 = vpop.f32.mrb[0].mxu1 }
  0xf1   : > { %v408_v7 = vpop.f32.mrb[1].mxu1 }
  0xf4   : > { %v667_v8 = vpop.f32.mrb[2].mxu1 }
  0xf5   : > { %v418_v9 = vpop.f32.mrb[3].mxu1 }
 0x103   : > { %v629_v10 = vpop.f32.mrb[0].mxu0 }
 0x104   : > { %v630_v11 = vpop.f32.mrb[1].mxu0 }
 0x105   : > { %v631_v12 = vadd.f32 %v630_v11, %v629_v10 }
 0x107   : > { %v409_v13 = vadd.f32 %v631_v12, %v408_v7  ;;  %v632_v14 = vpop.f32.mrb[2].mxu0 }
 0x108   : > { %v633_v15 = vpop.f32.mrb[3].mxu0 }
 0x109   : > { %v634_v16 = vadd.f32 %v633_v15, %v632_v14 }
 0x10b   : > { %v414_v17 = vadd.f32 %v664_v6, %v634_v16  ;;  %v635_v18 = vpop.f32.mrb[4].mxu0 }
 0x10c   : > { %v636_v19 = vpop.f32.mrb[5].mxu0 }
 0x10d   : > { %v720_v20 = vpack.c.bf16 %v414_v17, %v409_v13  ;;  %v637_v21 = vadd.f32 %v636_v19, %v635_v18 }
 0x10f   : > { %v419_v22 = vadd.f32 %v637_v21, %v418_v9  ;;  %v638_v23 = vpop.f32.mrb[6].mxu0  ;;  %721 = vmatpush3.bf16.msra.mxu1 %v720_v20 }
 0x110   : > { %v639_v24 = vpop.f32.mrb[7].mxu0  ;;  %722 = vmatprep.subr.bf16.mxu1 %v834_v2 }
 0x111   : > { %v640_v25 = vadd.f32 %v639_v24, %v638_v23 }
 0x113   : > { %v424_v26 = vadd.f32 %v667_v8, %v640_v25 }
 0x115   : > { %v723_v27 = vpack.c.bf16 %v424_v26, %v419_v22 }
 0x117   : > { %724 = vmatpush3.bf16.msra.mxu1 %v723_v27 }
 0x11a   : > { %677 = vmatmul.mubr.msk.f32.vlgmr.msra.gmra.mrb[4].mxu1 %vm244_vm0, %v427_v28 }
 0x1ed   : > { %v503_v30 = vpop.f32.mrb[4].mxu1 }
 0x1ee   : > { %v504_v31 = vadd.f32 %v503_v30, %v432_v29  ;;  %v678_v32 = vpop.f32.mrb[5].mxu1 }
 0x1f0   : > { %508 = vst.msk [vmem:[%s190_s27] sm:$0xf] %vm507_vm2, %v504_v31 }
 0x1f1   : > { %783 = shalt.err (!%p780_p3)
}
 0x1f2   : > { %s784_s12 = scalar_lea.hbm %s1055_s5, 64  ;;  %s788_s7 = scalar_lea.hbm %s1101_s4, 128 }
 0x1f3   : > { %p785_p4 = scmp.ne.s32.totalorder %s1055_s5, %s784_s12  ;;  %p789_p9 = scmp.lt.u32.totalorder %s1055_s5, %s1101_s4 }
 0x1f4   : > { %p790_p10 = scmp.lt.u32.totalorder %s788_s7, %s784_s12  ;;  %p792_p12 = scmp.lt.u32.totalorder %s784_s12, %s1055_s5 }
 0x1f5   : > { %p786_p7 = pnand %p785_p4, %p902_p5 }
 0x1f6   : > { %p791_p11 = por %p790_p10, %p789_p9 }
 0x1f7   : > { %p787_p8 = pneg %p786_p7 }
 0x1f8   : > { %p793_p13 = por %p792_p12, %p791_p11 }
 0x1fa   : > { %p794_p0 = pnand %p793_p13, %p787_p8 }
 0x1fc   : > { %797 = shalt.err (!%p794_p0)
}
 0x1fd   : > { %726 = dma.vmem_to_hbm [thread:$0]  (%p902_p5), %s1057_s28, 64, %s1055_s5, %s510_s6  }
 0x1fe PF: > { %p732_p1 = scmp.ge.s32.totalorder %s832_s18, 2  ;;  %s535_s9 = sand.u32 1, %s820_s15  }
 0x1ff   : > { %s536_s23 = scalar_lea.sflag [#allocation3], %s535_s9 }
 0x200   : > { %p729_p2 = pnand %p732_p1, %p906_p6 }
 0x202   : > { %815 = dma.done.wait (!%p729_p2), %s536_s23, 64  }
 0x203   : > { %817 = vsyncadd (!%p729_p2), %s536_s23, 4294967232  ;;  %p14_p3 = scmp.ge.s32.totalorder %s889_s21, 4   ;;  %s1104_s15 = smov %s824_s16 }
 0x204   : > { %s1105_s16 = smov %s828_s17  ;;  %s1106_s17 = smov %s900_s24 }
 0x205   : > { %s1107_s18 = smov %s889_s21  ;;  %16 = sbr.rel (!%p14_p3) target bundleno = 3 (0x3), region = 71 }
 0x20c   :  { %541 = vsyncpa [#allocation3], 1 }
 0x20d   :  { %543 = vsyncpa [#allocation3 + $0x1], 1 }

</bundles_post_ra>
